<compile_context>
chip_gen: v7x
topology: tpu7x:2x2x1
jax: 0.10.0
libtpu: 0.0.40
codegen_flags: <defaults>
</compile_context>

<pallas_src>
import jax
import jax.numpy as jnp
from jax.experimental import pallas as pl
from jax.experimental.pallas import tpu as pltpu


def _logits_kernel(x_ref, w_ref, b_ref, o_ref):
    # logits = x @ W^T + b, transpose expressed as contraction dims (no
    # materialized transpose of the weight tile).
    o_ref[...] = (
        jax.lax.dot_general(
            x_ref[...],
            w_ref[...],
            dimension_numbers=(((1,), (1,)), ((), ())),
            preferred_element_type=jnp.float32,
        )
        + b_ref[...]
    ).astype(o_ref.dtype)


def _fused_loss_kernel(x_ref, w_ref, b_ref, y_ref, loss_ref):
    # Fused: linear -> stable log-softmax -> NLL -> mean over batch.
    logits = (
        jax.lax.dot_general(
            x_ref[...],
            w_ref[...],
            dimension_numbers=(((1,), (1,)), ((), ())),
            preferred_element_type=jnp.float32,
        )
        + b_ref[...]
    )                                                           # [B, C] f32
    bsz, n_cls = logits.shape

    m = jnp.max(logits, axis=-1, keepdims=True)                 # [B, 1]
    shifted = logits - m                                        # [B, C]
    lse = jnp.log(jnp.sum(jnp.exp(shifted), axis=-1, keepdims=True))  # [B, 1]

    # Extract shifted logit at the label column via an iota==label mask
    # (in-kernel "one-hot select"; y_ref is [B, 1] int32 in VMEM).
    cls_ids = jax.lax.broadcasted_iota(jnp.int32, (bsz, n_cls), 1)
    at_label = jnp.sum(
        jnp.where(cls_ids == y_ref[...], shifted, 0.0),
        axis=-1, keepdims=True,
    )                                                           # [B, 1]

    # per-example CE = lse - (logit_y - m) ; mean over batch.
    per_ex = lse - at_label                                     # [B, 1]
    # NOTE: divides by the block-local batch; valid because the whole batch is one block.
    loss_ref[...] = jnp.sum(per_ex, axis=0, keepdims=True) * (1.0 / bsz)  # [1, 1]


def torch_model_forward(x, w, b, y=None):
    """Equivalent of TorchModel.forward(x, y).

    x: [B, in_features] f32
    w: [out_features, in_features] f32 (PyTorch nn.Linear layout)
    b: [out_features] f32
    y: optional [B] int class ids -> returns scalar CE loss; else returns logits.
    """
    B, _ = x.shape
    Dout = w.shape[0]
    b2 = b.reshape(1, Dout).astype(jnp.float32)

    vmem = pl.BlockSpec(memory_space=pltpu.MemorySpace.VMEM)  # whole-array, no grid

    if y is None:
        return pl.pallas_call(
            _logits_kernel,
            out_shape=jax.ShapeDtypeStruct((B, Dout), jnp.float32),
            in_specs=[vmem, vmem, vmem],
            out_specs=vmem,
        )(x.astype(jnp.float32), w.astype(jnp.float32), b2)

    y2 = y.reshape(B, 1).astype(jnp.int32)
    loss = pl.pallas_call(
        _fused_loss_kernel,
        out_shape=jax.ShapeDtypeStruct((1, 1), jnp.float32),
        in_specs=[vmem, vmem, vmem, vmem],
        out_specs=vmem,
    )(x.astype(jnp.float32), w.astype(jnp.float32), b2, y2)
    return loss[0, 0]


if __name__ == "__main__":
    key = jax.random.PRNGKey(0)
    k_x, k_y, k_w, k_b = jax.random.split(key, 4)

    B, D = 8, 5  # Linear(5, 5)
    x = jax.random.normal(k_x, (B, D), dtype=jnp.float32)
    y = jax.random.randint(k_y, (B,), 0, D, dtype=jnp.int32)

    # Deterministic parameter init (synthetic; mimics nn.Linear uniform init scale).
    bound = 1.0 / (D ** 0.5)
    w = jax.random.uniform(k_w, (D, D), minval=-bound, maxval=bound, dtype=jnp.float32)
    b = jax.random.uniform(k_b, (D,), minval=-bound, maxval=bound, dtype=jnp.float32)

    # Inference branch (y is None): returns logits.
    logits = jax.block_until_ready(torch_model_forward(x, w, b))

    # Training branch (y provided): returns scalar cross-entropy loss (fused kernel).
    loss = jax.block_until_ready(torch_model_forward(x, w, b, y))

    # Sanity check against plain-JAX reference.
    ref_logits = x @ w.T + b
    ref_logp = jax.nn.log_softmax(ref_logits, axis=-1)
    ref_loss = -jnp.mean(ref_logp[jnp.arange(B), y])
    assert jnp.allclose(logits, ref_logits, atol=1e-5), "logits mismatch"
    assert jnp.allclose(loss, ref_loss, atol=1e-5), "loss mismatch"

    print("KERNEL_OK")
</pallas_src>

<mosaic_0001>
module attributes {stable_mosaic.version = 11 : i64} {
  func.func @_logits_kernel(%arg0: memref<8x5xf32, #tpu.memory_space<vmem>>, %arg1: memref<5x5xf32, #tpu.memory_space<vmem>>, %arg2: memref<1x5xf32, #tpu.memory_space<vmem>>, %arg3: memref<8x5xf32, #tpu.memory_space<vmem>>) attributes {dimension_semantics = [], scalar_prefetch = 0 : i64, scratch_operands = 0 : i64, tpu.core_type = #tpu.core_type<tc>} {
    %c0 = arith.constant 0 : index
    %c0_0 = arith.constant 0 : index
    %0 = vector.load %arg0[%c0, %c0_0] : memref<8x5xf32, #tpu.memory_space<vmem>>, vector<8x5xf32>
    %c0_1 = arith.constant 0 : index
    %c0_2 = arith.constant 0 : index
    %1 = vector.load %arg1[%c0_1, %c0_2] : memref<5x5xf32, #tpu.memory_space<vmem>>, vector<5x5xf32>
    %cst = arith.constant dense<0.000000e+00> : vector<8x5xf32>
    %2 = tpu.matmul %0, %1, %cst {dimension_numbers = #tpu.dot_dimension_numbers<[1], [1], [0], [0], [0, 0, 1, 0], [], []>} : vector<8x5xf32>, vector<5x5xf32>, vector<8x5xf32> -> vector<8x5xf32>
    %c0_3 = arith.constant 0 : index
    %c0_4 = arith.constant 0 : index
    %3 = vector.load %arg2[%c0_3, %c0_4] : memref<1x5xf32, #tpu.memory_space<vmem>>, vector<1x5xf32>
    %4 = vector.broadcast %3 : vector<1x5xf32> to vector<8x5xf32>
    %5 = arith.addf %2, %4 : vector<8x5xf32>
    %c0_5 = arith.constant 0 : index
    %c0_6 = arith.constant 0 : index
    %6 = vector.load %arg3[%c0_5, %c0_6] : memref<8x5xf32, #tpu.memory_space<vmem>>, vector<8x5xf32>
    tpu.vector_store %arg3[%c0_5, %c0_6], %5 {strides = array<i32>} : memref<8x5xf32, #tpu.memory_space<vmem>>, vector<8x5xf32>,
    return
  }
}

</mosaic_0001>

<bundles_post_ra>
// kernel: tpu_custom_call.1
= control target key start
LH: loop header
LB: loop body
LE: loop exit
PB: predicated region body
PF: predicated region fallthrough
CT: control target
= control target key end

     0   :  { %8 = vsyncpa [#allocation3], 0  ;;  %s293_s0 = inlined_call_operand.hbm [shape: f32[8,5], index: 0, kind: input, shape index: {}]   ;;  %s294_s1 = inlined_call_operand.hbm [shape: f32[5,5], index: 1, kind: input, shape index: {}]   ;;  %s295_s2 = inlined_call_operand.vmem [shape: f32[1,5], index: 2, kind: input, shape index: {}]   ;;  %s296_s3 = inlined_call_operand.hbm [shape: f32[8,5], index: 3, kind: output, shape index: {}]  }
   0x1   :  { %9 = vsyncpa [#allocation6], 0 }
   0x2   :  { %10 = vsyncpa [#allocation4], 0  ;;  %s229_s12 = smov [#allocation2]   ;;  %s230_s14 = smov [#allocation5]  }
   0x3   :  { %s17_s13 = sshll.u32 %s229_s12, 4  ;;  %s27_s15 = sshll.u32 %s230_s14, 4  ;;  %s18_s13 = int_to_ptr.vmem [resolvable:$true] %s17_s13  ;;  %s28_s15 = int_to_ptr.vmem [resolvable:$true] %s27_s15 }
   0x4   :  { %s157_s18 = scalar_lea.hbm %s293_s0, 128 }
   0x5   :  { %p158_p0 = scmp.ne.s32.totalorder %s293_s0, %s157_s18  ;;  %p161_p1 = scmp.lt.u32.totalorder %s157_s18, %s293_s0 }
   0x7   :  { %p163_p2 = pnand %p161_p1, %p158_p0 }
   0x9   :  { %166 = shalt.err (!%p163_p2)
}
   0xa   :  { %s167_s23 = scalar_lea.vmem %s18_s13, 128  ;;  %p172_p4 = scmp.lt.s32.totalorder %s18_s13, %s18_s13 }
   0xb   :  { %p168_p3 = scmp.ne.s32.totalorder %s18_s13, %s167_s23  ;;  %p173_p5 = scmp.lt.s32.totalorder %s167_s23, %s167_s23 }
   0xd   :  { %p174_p6 = por %p173_p5, %p172_p4 }
   0xf   :  { %p175_p7 = pnand %p174_p6, %p168_p3 }
  0x11   :  { %178 = shalt.err (!%p175_p7)
}
  0x12   :  { %20 = dma.hbm_to_vmem [thread:$0]  %s293_s0, 128, %s18_s13, [#allocation3]  }
  0x13   :  { %s179_s28 = scalar_lea.hbm %s294_s1, 128 }
  0x14   :  { %p180_p8 = scmp.ne.s32.totalorder %s294_s1, %s179_s28  ;;  %p183_p9 = scmp.lt.u32.totalorder %s179_s28, %s294_s1 }
  0x16   :  { %p185_p10 = pnand %p183_p9, %p180_p8 }
  0x18   :  { %188 = shalt.err (!%p185_p10)
}
  0x19   :  { %s189_s6 = scalar_lea.vmem %s28_s15, 128  ;;  %p194_p12 = scmp.lt.s32.totalorder %s28_s15, %s28_s15 }
  0x1a   :  { %p190_p11 = scmp.ne.s32.totalorder %s28_s15, %s189_s6  ;;  %p195_p13 = scmp.lt.s32.totalorder %s189_s6, %s189_s6 }
  0x1c   :  { %p196_p0 = por %p195_p13, %p194_p12 }
  0x1e   :  { %p197_p1 = pnand %p196_p0, %p190_p11 }
  0x20   :  { %200 = shalt.err (!%p197_p1)
}
  0x21   :  { %30 = dma.hbm_to_vmem [thread:$0]  %s294_s1, 128, %s28_s15, [#allocation6]  }
  0x22   :  { %223 = dma.done.wait [#allocation3], 128  }
  0x23   :  { %224 = vsyncadd [#allocation3], 4294967168 }
  0x24   :  { %225 = dma.done.wait [#allocation6], 128  }
  0x25   :  { %226 = vsyncadd [#allocation6], 4294967168  ;;  %v231_v0 = vmov 0.0   ;;  %vm232_vm0 = vmmov 0   ;;  %vm48_vm1 = vcmask 39936   ;;  %v39_v2 = vld [vmem:[#allocation2] sm:$0xff] }
  0x26   :  { %147 = vmatprep.subr.mxu0 %v231_v0  ;;  %149 = vmatprep.mubr.msk.f32.mxu0 %vm232_vm0, %v231_v0  ;;  %v40_v1 = vld [vmem:[#allocation5] sm:$0x1f]  ;;  %v142_v3 = vld [vmem:[%s295_s2] ss:$0 sm:$0xff]  ;;  %s233_s10 = smov [#allocation7]  }
  0x27   :  { %148 = vmatpush3.xpose.msk.msra.mxu0 %vm48_vm1, %v40_v1  ;;  %s132_s11 = sshll.u32 %s233_s10, 4  ;;  %s133_s11 = int_to_ptr.vmem [resolvable:$true] %s132_s11 }
  0x28   :  { %s201_s1 = scalar_lea.vmem %s133_s11, 128  ;;  %p206_p3 = scmp.lt.s32.totalorder %s133_s11, %s133_s11 }
  0x29   :  { %p202_p2 = scmp.ne.s32.totalorder %s133_s11, %s201_s1  ;;  %p207_p4 = scmp.lt.s32.totalorder %s201_s1, %s201_s1 }
  0x2a   :  { %150 = vmatmul.mubr.msk.f32.vlgmr.msra.gmra.mrb[0].mxu0 %vm48_vm1, %v39_v2 }
  0x2b   :  { %p208_p5 = por %p207_p4, %p206_p3 }
  0x2d   :  { %p209_p6 = pnand %p208_p5, %p202_p2 }
  0xfd   :  { %v121_v4 = vpop.f32.mrb[0].mxu0 }
  0xfe   :  { %v122_v5 = vadd.f32 %v142_v3, %v121_v4  ;;  %v151_v6 = vpop.f32.mrb[1].mxu0 }
 0x100   :  { %125 = vst.msk [vmem:[#allocation7] sm:$0xff] %vm48_vm1, %v122_v5 }
 0x101   :  { %212 = shalt.err (!%p209_p6)
}
 0x102   :  { %s213_s14 = scalar_lea.hbm %s296_s3, 128 }
 0x103   :  { %p214_p7 = scmp.ne.s32.totalorder %s296_s3, %s213_s14  ;;  %p217_p8 = scmp.lt.u32.totalorder %s213_s14, %s296_s3 }
 0x105   :  { %p219_p9 = pnand %p217_p8, %p214_p7 }
 0x107   :  { %222 = shalt.err (!%p219_p9)
}
 0x108   :  { %135 = dma.vmem_to_hbm [thread:$0]  %s133_s11, 128, %s296_s3, [#allocation4]  }
 0x109   :  { %227 = dma.done.wait [#allocation4], 128  }
 0x10a   :  { %228 = vsyncadd [#allocation4], 4294967168 }
 0x10b   :  { %139 = vsyncpa [#allocation3], 1 }
 0x10c   :  { %140 = vsyncpa [#allocation6], 1 }
 0x10d   :  { %141 = vsyncpa [#allocation4], 1 }

</bundles_post_ra>
